<compile_context>
chip_gen: v7x
topology: tpu7x:2x2x1
jax: 0.10.0
libtpu: 0.0.40
codegen_flags: <defaults>
</compile_context>

<pallas_src>
import math
import functools

import jax
import jax.numpy as jnp
from jax import lax
from jax.experimental import pallas as pl
from jax.experimental.pallas import tpu as pltpu

_LANE = 128
_SUBLANE = 8
_TARGET_BLOCK_BYTES = 2 * 1024 * 1024   # ~2 MiB blocks: ~85% HBM roofline, fits 64 MiB VMEM (v7x)


def build_pe_table(d_model: int, max_seq_len: int) -> jnp.ndarray:
    """Sinusoidal positional-encoding buffer, shape (1, max_seq_len, d_model). Build once at init."""
    position = jnp.arange(max_seq_len, dtype=jnp.float32)[:, None]
    div_term = jnp.exp(jnp.arange(0, d_model, 2, dtype=jnp.float32)
                       * (-math.log(10000.0) / d_model))
    pe = jnp.zeros((max_seq_len, d_model), dtype=jnp.float32)
    pe = pe.at[:, 0::2].set(jnp.sin(position * div_term))
    pe = pe.at[:, 1::2].set(jnp.cos(position * div_term))
    return pe[None, :, :]


def _pe_dropout_kernel(seed_ref, x_ref, pe_ref, o_ref, *,
                       dropout_p: float, training: bool,
                       row_tile: int, lane_tile: int, total_cols: int):
    # x_ref: (rt, ct) tile of the (Rp, C) slab; pe_ref: (rt, ct) or (1, ct) float32 (broadcasts).
    y = x_ref[...].astype(jnp.float32) + pe_ref[...]

    if training and dropout_p > 0.0:
        # Counter-based murmur3-fmix32 dropout, done in uint32 so right shifts are logical
        # (no emulation masks). One unique counter per element, 24-bit integer threshold.
        rows = lax.broadcasted_iota(jnp.int32, y.shape, 0)
        cols = lax.broadcasted_iota(jnp.int32, y.shape, 1)
        r0 = pl.program_id(1) * row_tile
        c0 = pl.program_id(0) * lane_tile
        salt = seed_ref[0] * jnp.int32(-1640531527)          # seed * golden-ratio constant (wraps)
        base = r0 * jnp.int32(total_cols) + c0 + salt        # scalar offset for this tile
        idx = rows * jnp.int32(total_cols) + cols + base     # unique (mod 2^32) per element
        h = pltpu.bitcast(idx, jnp.uint32)
        h = h ^ (h >> 16)
        h = h * jnp.uint32(0x85EBCA6B)
        h = h ^ (h >> 13)
        h = h * jnp.uint32(0xC2B2AE35)
        h = h ^ (h >> 16)
        thresh = jnp.uint32(int(round(dropout_p * (1 << 24))))
        keep = (h >> 8) >= thresh                            # P(keep) = 1 - p (to 1/2^24)
        scale = jnp.float32(1.0 / (1.0 - dropout_p))
        y = jnp.where(keep, y * scale, jnp.float32(0.0))

    o_ref[...] = y.astype(o_ref.dtype)


def _divisors(n: int):
    return [i for i in range(1, n + 1) if n % i == 0]


def _largest_aligned_divisor(C: int, cap: int) -> int:
    """Largest multiple-of-128 divisor of C that is <= cap (128 always divides C here)."""
    best = _LANE
    for cand in range(_LANE, min(C, max(cap, _LANE)) + 1, _LANE):
        if C % cand == 0:
            best = cand
    return best


def _plan_layout(B: int, S: int, D: int, itemsize: int, target_bytes: int) -> dict:
    """Pick the 2-D slab view (rows, cols) and the (row_tile, lane_tile) block."""
    L = S * D
    if L % _LANE == 0:
        # Fold a factor g of S into the row (sublane) axis: slab = (B*g, (S//g)*D),
        # per-row chunk a multiple of 128 lanes -> lane-dense unmasked stores, >=8 sublanes.
        def _rt_unit(gg):
            return gg * _SUBLANE // math.gcd(gg, _SUBLANE)   # lcm(g, 8)

        valid = [gg for gg in _divisors(S)
                 if ((S // gg) * D) % _LANE == 0 and gg <= 64]
        # prefer a g whose row-tile unit divides B*g (no row padding -> no extra pad copy)
        no_pad = [gg for gg in valid if (B * gg) % _rt_unit(gg) == 0]
        g = max(no_pad) if no_pad else max(valid)
        C = (S // g) * D
        R = B * g
        rt_unit = _rt_unit(g)
        ct = _largest_aligned_divisor(C, max(_LANE, target_bytes // (rt_unit * itemsize)))
        m_max = -(-R // rt_unit)
        m = max(1, min(target_bytes // (rt_unit * ct * itemsize), m_max))
        if R % rt_unit == 0:
            q = R // rt_unit
            while q % m != 0:          # snap to a divisor of the row-tile count -> no padding
                m -= 1
        rt = m * rt_unit
        Rp = -(-R // rt) * rt
        return dict(mode="fold", g=g, C=C, R=R, Rp=Rp, rt=rt, ct=ct, pad_cols=0)

    # TODO(synk): S*D not a multiple of 128 -- lane-pad the flattened (B, S*D) slab; sublane
    # utilization stays at B rows in this rare fallback (and huge prime B could exceed VMEM).
    Lp = -(-L // _LANE) * _LANE
    rt = B
    for d in _divisors(B):
        if d % _SUBLANE == 0 and d * _LANE * itemsize <= target_bytes:
            rt = d
    ct = _largest_aligned_divisor(Lp, max(_LANE, target_bytes // (max(rt, 1) * itemsize)))
    return dict(mode="flat", g=1, C=Lp, R=B, Rp=B, rt=rt, ct=ct, pad_cols=Lp - L)


def positional_encoding_forward(x: jnp.ndarray,
                                pe: jnp.ndarray,
                                *,
                                dropout_p: float,
                                training: bool,
                                seed: int = 0) -> jnp.ndarray:
    """x: (B, seq_len, d_model); pe: (1, max_seq_len, d_model) float32 buffer."""
    B, S, D = x.shape
    if training and dropout_p >= 1.0:
        return jnp.zeros_like(x)

    itemsize = jnp.dtype(x.dtype).itemsize
    plan = _plan_layout(B, S, D, itemsize, _TARGET_BLOCK_BYTES)
    g, C, R, Rp, rt, ct = plan["g"], plan["C"], plan["R"], plan["Rp"], plan["rt"], plan["ct"]

    # pe preparation is cheap and static per (S, tile) config; cache at module init if hot.
    pe_s = pe[0, :S, :].astype(jnp.float32)
    if plan["mode"] == "fold":
        x2 = x.reshape(R, C)
        if Rp != R:
            x2 = jnp.pad(x2, ((0, Rp - R), (0, 0)))
        # One row-tile's worth of pe: g distinct rows tiled to rt rows (row-tile starts are
        # multiples of g, so the same pe block matches every row tile).
        pe_blk = jnp.tile(pe_s.reshape(g, C), (rt // g, 1))
        pe_rows = rt
    else:
        L = S * D
        x2 = x.reshape(B, L)
        pe_blk = pe_s.reshape(1, L)
        if plan["pad_cols"]:
            x2 = jnp.pad(x2, ((0, 0), (0, plan["pad_cols"])))
            pe_blk = jnp.pad(pe_blk, ((0, 0), (0, plan["pad_cols"])))
        pe_rows = 1

    n_r = Rp // rt
    n_c = C // ct
    seed_arr = jnp.asarray([seed], dtype=jnp.int32)

    kernel = functools.partial(_pe_dropout_kernel,
                               dropout_p=float(dropout_p),
                               training=bool(training),
                               row_tile=rt, lane_tile=ct, total_cols=C)

    # VMEM: double-buffered x + out blocks + pe block, plus headroom; cap at 32 MiB (v7x-safe).
    blk_in = rt * ct * itemsize
    blk_pe = pe_rows * ct * 4
    need = 2 * (2 * blk_in + blk_pe) + (2 << 20)
    vmem_bytes = int(min(32 * 1024 * 1024, max(16 * 1024 * 1024, need)))

    grid_spec = pltpu.PrefetchScalarGridSpec(
        num_scalar_prefetch=1,                               # seed lands in SMEM
        grid=(n_c, n_r),                                     # row axis innermost -> pe block reused
        in_specs=[
            pl.BlockSpec((rt, ct), lambda c, r, seed: (r, c)),        # x tile
            pl.BlockSpec((pe_rows, ct), lambda c, r, seed: (0, c)),   # pe tile (row-invariant)
        ],
        out_specs=pl.BlockSpec((rt, ct), lambda c, r, seed: (r, c)),
    )

    out2 = pl.pallas_call(
        kernel,
        out_shape=jax.ShapeDtypeStruct((Rp, C), x.dtype),
        grid_spec=grid_spec,
        compiler_params=pltpu.CompilerParams(
            dimension_semantics=("parallel", "parallel"),
            vmem_limit_bytes=vmem_bytes,
        ),
    )(seed_arr, x2, pe_blk)

    if plan["mode"] == "fold":
        return out2[:R].reshape(B, S, D)
    return out2[:, :S * D].reshape(B, S, D)


if __name__ == "__main__":
    # Module config (deterministic, synthetic)
    d_model = 32
    max_seq_len = 16
    dropout_p = 0.1

    # Input: batch=2, seq=8, d_model=32
    B, S = 2, 8
    key = jax.random.PRNGKey(0)
    x = jax.random.normal(key, (B, S, d_model), dtype=jnp.float32)
    pe = build_pe_table(d_model, max_seq_len)

    # Eval mode (dropout = identity): must match x + pe[:, :S, :]
    out_eval = jax.block_until_ready(
        positional_encoding_forward(x, pe, dropout_p=dropout_p, training=False))
    ref = x + pe[:, :S, :]
    assert out_eval.shape == (B, S, d_model)
    assert jnp.allclose(out_eval, ref, atol=1e-6), "eval-mode mismatch"

    # Training mode (exercises the in-kernel uint32 hash-dropout path)
    out_train = jax.block_until_ready(
        positional_encoding_forward(x, pe, dropout_p=dropout_p, training=True, seed=0))
    assert out_train.shape == (B, S, d_model)
    expected = ref / (1.0 - dropout_p)
    # Classify each element as kept (==scaled) or dropped (==0); ignore elements whose
    # reference value is itself ~0 (they would be ambiguous).
    nz = jnp.abs(ref) > 1e-3
    kept = jnp.isclose(out_train, expected, rtol=1e-5, atol=1e-5)
    dropped = jnp.abs(out_train) <= 1e-6
    assert bool(jnp.all(kept | dropped | ~nz)), "training-mode dropout values inconsistent"
    keep_frac = float(jnp.sum(kept & nz) / jnp.maximum(jnp.sum(nz), 1))
    assert 0.7 <= keep_frac <= 0.99, f"unreasonable keep fraction {keep_frac}"

    print("KERNEL_OK")
</pallas_src>

<mosaic_0001>
module attributes {stable_mosaic.version = 11 : i64} {
  func.func @_pe_dropout_kernel(%arg0: i32, %arg1: i32, %arg2: memref<1xi32, #tpu.memory_space<smem>>, %arg3: memref<8x128xf32, #tpu.memory_space<vmem>>, %arg4: memref<8x128xf32, #tpu.memory_space<vmem>>, %arg5: memref<8x128xf32, #tpu.memory_space<vmem>>) attributes {dimension_semantics = [#tpu.dimension_semantics<parallel>, #tpu.dimension_semantics<parallel>], iteration_bounds = array<i64: 1, 1>, scalar_prefetch = 1 : i64, scratch_operands = 0 : i64, tpu.core_type = #tpu.core_type<tc>, window_params = [{transform_indices = @transform_0, window_bounds = array<i64: 8, 128>}, {transform_indices = @transform_1, window_bounds = array<i64: 8, 128>}, {transform_indices = @transform_2, window_bounds = array<i64: 8, 128>}]} {
    %c0 = arith.constant 0 : index
    %c0_0 = arith.constant 0 : index
    %0 = vector.load %arg3[%c0, %c0_0] : memref<8x128xf32, #tpu.memory_space<vmem>>, vector<8x128xf32>
    %c0_1 = arith.constant 0 : index
    %c0_2 = arith.constant 0 : index
    %1 = vector.load %arg4[%c0_1, %c0_2] : memref<8x128xf32, #tpu.memory_space<vmem>>, vector<8x128xf32>
    %2 = arith.addf %0, %1 : vector<8x128xf32>
    %c0_3 = arith.constant 0 : index
    %c0_4 = arith.constant 0 : index
    %3 = vector.load %arg5[%c0_3, %c0_4] : memref<8x128xf32, #tpu.memory_space<vmem>>, vector<8x128xf32>
    tpu.vector_store %arg5[%c0_3, %c0_4], %2 {strides = array<i32>} : memref<8x128xf32, #tpu.memory_space<vmem>>, vector<8x128xf32>,
    return
  }
  func.func @transform_0(%arg0: i32, %arg1: i32, %arg2: memref<1xi32, #tpu.memory_space<smem>>) -> (i32, i32) {
    %c0_i32 = arith.constant 0 : i32
    return %arg1, %arg0 : i32, i32
  }
  func.func @transform_1(%arg0: i32, %arg1: i32, %arg2: memref<1xi32, #tpu.memory_space<smem>>) -> (i32, i32) {
    %c0_i32 = arith.constant 0 : i32
    %c0_i32_0 = arith.constant 0 : i32
    return %c0_i32, %arg0 : i32, i32
  }
  func.func @transform_2(%arg0: i32, %arg1: i32, %arg2: memref<1xi32, #tpu.memory_space<smem>>) -> (i32, i32) {
    %c0_i32 = arith.constant 0 : i32
    return %arg1, %arg0 : i32, i32
  }
}

</mosaic_0001>

<bundles_post_ra>
// kernel: tpu_custom_call.1
= control target key start
LH: loop header
LB: loop body
LE: loop exit
PB: predicated region body
PF: predicated region fallthrough
CT: control target
= control target key end

     0   :  { %9 = vsyncpa [#allocation5], 0  ;;  %s192_s0 = inlined_call_operand.<no memory space> [shape: s32[1], index: 0, kind: input, shape index: {}]   ;;  %s193_s1 = inlined_call_operand.hbm [shape: f32[8,128], index: 1, kind: input, shape index: {}]   ;;  %s194_s2 = inlined_call_operand.hbm [shape: f32[8,128], index: 2, kind: input, shape index: {}]   ;;  %s195_s3 = inlined_call_operand.hbm [shape: f32[8,128], index: 3, kind: output, shape index: {}]  }
   0x1   :  { %10 = vsyncpa [#allocation8], 0 }
   0x2   :  { %11 = vsyncpa [#allocation6], 0  ;;  %s133_s12 = smov [#allocation4]   ;;  %s134_s14 = smov [#allocation7]  }
   0x3   :  { %s18_s13 = sshll.u32 %s133_s12, 4  ;;  %s28_s15 = sshll.u32 %s134_s14, 4  ;;  %s19_s13 = int_to_ptr.vmem [resolvable:$true] %s18_s13  ;;  %s29_s15 = int_to_ptr.vmem [resolvable:$true] %s28_s15 }
   0x4   :  { %s61_s17 = scalar_lea.hbm %s193_s1, 128 }
   0x5   :  { %p62_p0 = scmp.ne.s32.totalorder %s193_s1, %s61_s17  ;;  %p65_p1 = scmp.lt.u32.totalorder %s61_s17, %s193_s1 }
   0x7   :  { %p67_p2 = pnand %p65_p1, %p62_p0 }
   0x9   :  { %70 = shalt.err (!%p67_p2)
}
   0xa   :  { %s71_s22 = scalar_lea.vmem %s19_s13, 128  ;;  %p76_p4 = scmp.lt.s32.totalorder %s19_s13, %s19_s13 }
   0xb   :  { %p72_p3 = scmp.ne.s32.totalorder %s19_s13, %s71_s22  ;;  %p77_p5 = scmp.lt.s32.totalorder %s71_s22, %s71_s22 }
   0xd   :  { %p78_p6 = por %p77_p5, %p76_p4 }
   0xf   :  { %p79_p7 = pnand %p78_p6, %p72_p3 }
  0x11   :  { %82 = shalt.err (!%p79_p7)
}
  0x12   :  { %21 = dma.hbm_to_vmem [thread:$0]  %s193_s1, 128, %s19_s13, [#allocation5]  }
  0x13   :  { %s83_s27 = scalar_lea.hbm %s194_s2, 128 }
  0x14   :  { %p84_p8 = scmp.ne.s32.totalorder %s194_s2, %s83_s27  ;;  %p87_p9 = scmp.lt.u32.totalorder %s83_s27, %s194_s2 }
  0x16   :  { %p89_p10 = pnand %p87_p9, %p84_p8 }
  0x18   :  { %92 = shalt.err (!%p89_p10)
}
  0x19   :  { %s93_s5 = scalar_lea.vmem %s29_s15, 128  ;;  %p98_p12 = scmp.lt.s32.totalorder %s29_s15, %s29_s15 }
  0x1a   :  { %p94_p11 = scmp.ne.s32.totalorder %s29_s15, %s93_s5  ;;  %p99_p13 = scmp.lt.s32.totalorder %s93_s5, %s93_s5 }
  0x1c   :  { %p100_p0 = por %p99_p13, %p98_p12 }
  0x1e   :  { %p101_p1 = pnand %p100_p0, %p94_p11 }
  0x20   :  { %104 = shalt.err (!%p101_p1)
}
  0x21   :  { %31 = dma.hbm_to_vmem [thread:$0]  %s194_s2, 128, %s29_s15, [#allocation8]  }
  0x22   :  { %127 = dma.done.wait [#allocation5], 128  }
  0x23   :  { %128 = vsyncadd [#allocation5], 4294967168 }
  0x24   :  { %129 = dma.done.wait [#allocation8], 128  }
  0x25   :  { %130 = vsyncadd [#allocation8], 4294967168  ;;  %s135_s7 = smov [#allocation9]   ;;  %v38_v0 = vld [vmem:[#allocation4] sm:$0xff]  ;;  %v39_v1 = vld [vmem:[#allocation7] sm:$0xff] }
  0x26   :  { %s48_s8 = sshll.u32 %s135_s7, 4  ;;  %v40_v2 = vadd.f32 %v39_v1, %v38_v0  ;;  %s49_s8 = int_to_ptr.vmem [resolvable:$true] %s48_s8 }
  0x27   :  { %s105_s9 = scalar_lea.vmem %s49_s8, 128  ;;  %p110_p3 = scmp.lt.s32.totalorder %s49_s8, %s49_s8 }
  0x28   :  { %41 = vst [vmem:[#allocation9] sm:$0xff] %v40_v2  ;;  %p106_p2 = scmp.ne.s32.totalorder %s49_s8, %s105_s9  ;;  %p111_p4 = scmp.lt.s32.totalorder %s105_s9, %s105_s9 }
  0x2a   :  { %p112_p5 = por %p111_p4, %p110_p3 }
  0x2c   :  { %p113_p6 = pnand %p112_p5, %p106_p2 }
  0x2e   :  { %116 = shalt.err (!%p113_p6)
}
  0x2f   :  { %s117_s11 = scalar_lea.hbm %s195_s3, 128 }
  0x30   :  { %p118_p7 = scmp.ne.s32.totalorder %s195_s3, %s117_s11  ;;  %p121_p8 = scmp.lt.u32.totalorder %s117_s11, %s195_s3 }
  0x32   :  { %p123_p9 = pnand %p121_p8, %p118_p7 }
  0x34   :  { %126 = shalt.err (!%p123_p9)
}
  0x35   :  { %51 = dma.vmem_to_hbm [thread:$0]  %s49_s8, 128, %s195_s3, [#allocation6]  }
  0x36   :  { %131 = dma.done.wait [#allocation6], 128  }
  0x37   :  { %132 = vsyncadd [#allocation6], 4294967168 }
  0x38   :  { %55 = vsyncpa [#allocation5], 1 }
  0x39   :  { %56 = vsyncpa [#allocation8], 1 }
  0x3a   :  { %57 = vsyncpa [#allocation6], 1 }

</bundles_post_ra>
